<compile_context>
chip_gen: v5e
topology: v5e:2x2
jax: 0.10.0
libtpu: 0.0.40
codegen_flags: <defaults>
</compile_context>

<pallas_src>
import math
import functools

import numpy as np
import jax
import jax.numpy as jnp
from jax import lax
from jax.experimental import pallas as pl
from jax.experimental.pallas import tpu as pltpu


_VMEM_LIMIT_BYTES = 32 * 1024 * 1024  # explicit scoped-VMEM budget (fits all gens)


def _sigmoid(v):
    return 1.0 / (1.0 + jnp.exp(-v))


# ----------------------------------------------------------------------------
# Pallas kernel 1: decode -> packed pred boxes [px, py, pw, ph]
# ----------------------------------------------------------------------------
def _decode_kernel(act_ref, gx_ref, gy_ref, aw_ref, ah_ref, pb_ref):
    # act_ref : (1, nA, CB, HW)  raw activations (only channels 0..3 used here)
    # gx_ref  : (1, 1, HW)       per-cell grid x (tiny constant row, ~KBs)
    # gy_ref  : (1, 1, HW)       per-cell grid y
    # aw_ref  : (1, nA, 1)       anchor widths   (broadcast along lanes)
    # ah_ref  : (1, nA, 1)       anchor heights
    # pb_ref  : (4, 1, nA, HW)   packed [px, py, pw, ph]
    xr = act_ref[:, :, 0, :]
    yr = act_ref[:, :, 1, :]
    wr = act_ref[:, :, 2, :]
    hr = act_ref[:, :, 3, :]
    x = _sigmoid(xr)
    y = _sigmoid(yr)
    pb_ref[0] = x + gx_ref[...]
    pb_ref[1] = y + gy_ref[...]
    pb_ref[2] = jnp.exp(wr) * aw_ref[...]
    pb_ref[3] = jnp.exp(hr) * ah_ref[...]


def decode_pallas(act, gx_row, gy_row, anchor_w, anchor_h):
    nB, nA, C5, HW = act.shape
    # Only channels 0..4 are needed; fetch an aligned 8-channel sub-block so the
    # (possibly huge) class logits are never DMA'd by the decode kernel.
    cb = 8 if C5 > 8 else C5
    return pl.pallas_call(
        _decode_kernel,
        out_shape=jax.ShapeDtypeStruct((4, nB, nA, HW), jnp.float32),
        grid=(nB,),
        in_specs=[
            pl.BlockSpec((1, nA, cb, HW), lambda b: (b, 0, 0, 0)),
            pl.BlockSpec((1, 1, HW), lambda b: (0, 0, 0)),
            pl.BlockSpec((1, 1, HW), lambda b: (0, 0, 0)),
            pl.BlockSpec((1, nA, 1), lambda b: (0, 0, 0)),
            pl.BlockSpec((1, nA, 1), lambda b: (0, 0, 0)),
        ],
        out_specs=pl.BlockSpec((4, 1, nA, HW), lambda b: (0, b, 0, 0)),
        compiler_params=pltpu.CompilerParams(
            dimension_semantics=("parallel",),
            vmem_limit_bytes=_VMEM_LIMIT_BYTES),
    )(act, gx_row, gy_row, anchor_w, anchor_h)


# ----------------------------------------------------------------------------
# Pallas kernel 2: masked SmoothL1 / MSE / focal-loss partial sums per batch
# ----------------------------------------------------------------------------
def _loss_kernel(num_classes, coord_scale, class_scale,
                 act_ref, tx_ref, ty_ref, tw_ref, th_ref, tconf_ref,
                 cmask_ref, confmask_ref, tcls_ref, clsmask_ref, out_ref):
    nC = num_classes
    # Recompute the sigmoids here instead of reading extra decode outputs.
    x = _sigmoid(act_ref[:, :, 0, :])
    y = _sigmoid(act_ref[:, :, 1, :])
    w = act_ref[:, :, 2, :]
    h = act_ref[:, :, 3, :]
    conf = _sigmoid(act_ref[:, :, 4, :])

    cmask = cmask_ref[...]

    def smooth_l1_sum(a, b):
        # cmask is exactly {0, 1}: (a - b) * m == a*m - b*m
        d = (a - b) * cmask
        ad = jnp.abs(d)
        return jnp.sum(jnp.where(ad < 1.0, 0.5 * d * d, ad - 0.5))

    loss_x = coord_scale * smooth_l1_sum(x, tx_ref[...]) * 0.5
    loss_y = coord_scale * smooth_l1_sum(y, ty_ref[...]) * 0.5
    loss_w = coord_scale * smooth_l1_sum(w, tw_ref[...]) * 0.5
    loss_h = coord_scale * smooth_l1_sum(h, th_ref[...]) * 0.5

    dconf = (conf - tconf_ref[...]) * confmask_ref[...]
    loss_conf = 0.5 * jnp.sum(dconf * dconf)

    # Focal classification loss (gamma=2, alpha=1, size_average=False),
    # vectorized over the class (sublane) axis with a stable log-softmax and
    # gated by cls_mask BEFORE any inf can appear.
    logits = act_ref[:, :, 5:5 + nC, :]                     # (1, nA, nC, HW)
    m = jnp.max(logits, axis=2, keepdims=True)
    den = jnp.sum(jnp.exp(logits - m), axis=2)              # (1, nA, HW)
    cidx = lax.broadcasted_iota(jnp.int32, logits.shape, 2)
    tcls_i = tcls_ref[...].astype(jnp.int32)
    onehot = (cidx == tcls_i[:, :, None, :]).astype(jnp.float32)
    logit_t = jnp.sum(logits * onehot, axis=2)              # (1, nA, HW)
    log_pt = logit_t - m[:, :, 0, :] - jnp.log(den)         # finite everywhere
    pt = jnp.exp(log_pt)
    focal = -(1.0 - pt) * (1.0 - pt) * log_pt
    loss_cls = class_scale * jnp.sum(focal * clsmask_ref[...])

    # nProposals (logging-only in the reference) -- keeps conf on device.
    n_prop = jnp.sum((conf > 0.25).astype(jnp.float32))

    # Pack the 7 per-batch partial scalars into row 0 of an (8,128) tile.
    sub = lax.broadcasted_iota(jnp.int32, (8, 128), 0)
    lane = lax.broadcasted_iota(jnp.int32, (8, 128), 1)
    tile = jnp.zeros((8, 128), jnp.float32)
    for i, v in enumerate((loss_x, loss_y, loss_w, loss_h,
                           loss_conf, loss_cls, n_prop)):
        tile = jnp.where((sub == 0) & (lane == i), v, tile)
    out_ref[0] = tile


def loss_pallas(coord_scale, class_scale, num_classes, act,
                tx, ty, tw, th, tconf, coord_mask, conf_mask_sqrt,
                tcls, cls_mask):
    nB, nA, C5, HW = act.shape
    kern = functools.partial(_loss_kernel, int(num_classes),
                             float(coord_scale), float(class_scale))
    act_spec = pl.BlockSpec((1, nA, C5, HW), lambda b: (b, 0, 0, 0))
    tgt_spec = pl.BlockSpec((1, nA, HW), lambda b: (b, 0, 0))
    return pl.pallas_call(
        kern,
        out_shape=jax.ShapeDtypeStruct((nB, 8, 128), jnp.float32),
        grid=(nB,),
        in_specs=[act_spec] + [tgt_spec] * 9,
        out_specs=pl.BlockSpec((1, 8, 128), lambda b: (b, 0, 0)),
        compiler_params=pltpu.CompilerParams(
            dimension_semantics=("parallel",),
            vmem_limit_bytes=_VMEM_LIMIT_BYTES),
    )(act, tx, ty, tw, th, tconf, coord_mask, conf_mask_sqrt, tcls, cls_mask)


# ----------------------------------------------------------------------------
# Host-side glue: build_targets (numpy), mirroring the PyTorch reference.
# TODO(synk): build_targets uses data-dependent early-break loops and scalar
#             scatter writes -- no clean Pallas equivalent; kept on host.
# ----------------------------------------------------------------------------
def _bbox_iou_np(box1, box2):
    mx = min(box1[0] - box1[2] / 2.0, box2[0] - box2[2] / 2.0)
    Mx = max(box1[0] + box1[2] / 2.0, box2[0] + box2[2] / 2.0)
    my = min(box1[1] - box1[3] / 2.0, box2[1] - box2[3] / 2.0)
    My = max(box1[1] + box1[3] / 2.0, box2[1] + box2[3] / 2.0)
    w1, h1, w2, h2 = box1[2], box1[3], box2[2], box2[3]
    uw = Mx - mx
    uh = My - my
    cw = w1 + w2 - uw
    ch = h1 + h2 - uh
    if cw <= 0 or ch <= 0:
        return 0.0
    carea = cw * ch
    uarea = w1 * h1 + w2 * h2 - carea
    return float(carea / uarea)


def _bbox_ious_np(boxes1, boxes2):
    mx = np.minimum(boxes1[0] - boxes1[2] / 2.0, boxes2[0] - boxes2[2] / 2.0)
    Mx = np.maximum(boxes1[0] + boxes1[2] / 2.0, boxes2[0] + boxes2[2] / 2.0)
    my = np.minimum(boxes1[1] - boxes1[3] / 2.0, boxes2[1] - boxes2[3] / 2.0)
    My = np.maximum(boxes1[1] + boxes1[3] / 2.0, boxes2[1] + boxes2[3] / 2.0)
    w1, h1, w2, h2 = boxes1[2], boxes1[3], boxes2[2], boxes2[3]
    uw = Mx - mx
    uh = My - my
    cw = w1 + w2 - uw
    ch = h1 + h2 - uh
    carea = cw * ch
    carea = np.where((cw <= 0) | (ch <= 0), 0.0, carea)
    uarea = w1 * h1 + w2 * h2 - carea
    return carea / uarea


def build_targets_np(pred_boxes, target, anchors, num_anchors, num_classes,
                     nH, nW, noobject_scale, object_scale, sil_thresh):
    nB = target.shape[0]
    nA = num_anchors
    anchor_step = len(anchors) // num_anchors
    conf_mask = np.ones((nB, nA, nH, nW), dtype=np.float32) * noobject_scale
    coord_mask = np.zeros((nB, nA, nH, nW), dtype=np.float32)
    cls_mask = np.zeros((nB, nA, nH, nW), dtype=np.float32)
    tx = np.zeros((nB, nA, nH, nW), dtype=np.float32)
    ty = np.zeros((nB, nA, nH, nW), dtype=np.float32)
    tw = np.zeros((nB, nA, nH, nW), dtype=np.float32)
    th = np.zeros((nB, nA, nH, nW), dtype=np.float32)
    tconf = np.zeros((nB, nA, nH, nW), dtype=np.float32)
    tcls = np.zeros((nB, nA, nH, nW), dtype=np.float32)
    nAnchors = nA * nH * nW
    nPixels = nH * nW

    for b in range(nB):
        cur_pred_boxes = pred_boxes[b * nAnchors:(b + 1) * nAnchors].T
        cur_ious = np.zeros(nAnchors, dtype=np.float32)
        for t in range(40):
            if target[b][t * 5 + 1] == 0:
                break
            gx = target[b][t * 5 + 1] * nW
            gy = target[b][t * 5 + 2] * nH
            gw = target[b][t * 5 + 3] * nW
            gh = target[b][t * 5 + 4] * nH
            cur_gt_boxes = np.tile(np.array([[gx], [gy], [gw], [gh]],
                                            dtype=np.float32), (1, nAnchors))
            cur_ious = np.maximum(cur_ious,
                                  _bbox_ious_np(cur_pred_boxes, cur_gt_boxes))
        cm = conf_mask[b].reshape(-1).copy()
        cm[cur_ious > sil_thresh] = 0.0
        conf_mask[b] = cm.reshape(nA, nH, nW)

    nGT = 0
    nCorrect = 0
    for b in range(nB):
        for t in range(40):
            if target[b][t * 5 + 1] == 0:
                break
            nGT += 1
            best_iou = 0.0
            best_n = -1
            gx = target[b][t * 5 + 1] * nW
            gy = target[b][t * 5 + 2] * nH
            gi = int(gx)
            gj = int(gy)
            gw = target[b][t * 5 + 3] * nW
            gh = target[b][t * 5 + 4] * nH
            gt_box = [0, 0, gw, gh]
            for n in range(nA):
                aw = anchors[anchor_step * n]
                ah = anchors[anchor_step * n + 1]
                anchor_box = [0, 0, aw, ah]
                iou = _bbox_iou_np(anchor_box, gt_box)
                if iou > best_iou:
                    best_iou = iou
                    best_n = n
            gt_box = [gx, gy, gw, gh]
            pred_box = pred_boxes[b * nAnchors + best_n * nPixels + gj * nW + gi]
            coord_mask[b][best_n][gj][gi] = 1
            cls_mask[b][best_n][gj][gi] = 1
            conf_mask[b][best_n][gj][gi] = object_scale
            tx[b][best_n][gj][gi] = target[b][t * 5 + 1] * nW - gi
            ty[b][best_n][gj][gi] = target[b][t * 5 + 2] * nH - gj
            tw[b][best_n][gj][gi] = math.log(gw / anchors[anchor_step * best_n])
            th[b][best_n][gj][gi] = math.log(gh / anchors[anchor_step * best_n + 1])
            iou = _bbox_iou_np(gt_box, pred_box)
            tconf[b][best_n][gj][gi] = iou
            tcls[b][best_n][gj][gi] = target[b][t * 5]
            if iou > 0.5:
                nCorrect += 1
    return (nGT, nCorrect, coord_mask, conf_mask, cls_mask,
            tx, ty, tw, th, tconf, tcls)


# ----------------------------------------------------------------------------
# RegionLoss forward
# ----------------------------------------------------------------------------
class RegionLossPallas:
    def __init__(self, anchors, num_anchors, num_classes,
                 object_scale=5.0, noobject_scale=1.0,
                 class_scale=1.0, coord_scale=1.0, thresh=0.4):
        self.anchors = [float(a) for a in anchors]
        self.num_anchors = int(num_anchors)
        self.num_classes = int(num_classes)
        self.anchor_step = len(self.anchors) // self.num_anchors
        self.object_scale = object_scale
        self.noobject_scale = noobject_scale
        self.class_scale = class_scale
        self.coord_scale = coord_scale
        self.thresh = thresh
        self._last = None
        self.n_proposals = None

    def forward(self, output, target):
        output = jnp.asarray(output, jnp.float32)
        nB, ch, nH, nW = output.shape
        nA = self.num_anchors
        nC = self.num_classes
        C5 = 5 + nC
        assert ch == nA * C5
        HW = nH * nW

        # Free (contiguous) reshape of the NCHW activation; fed directly into
        # both kernels -- no wrapper-side channel slices / transposes.
        act = output.reshape(nB, nA, C5, HW)

        # Tiny per-cell constants (KB-scale): grid rows and per-anchor scalars.
        gx_row = jnp.asarray(
            np.tile(np.arange(nW, dtype=np.float32), nH).reshape(1, 1, HW))
        gy_row = jnp.asarray(
            np.repeat(np.arange(nH, dtype=np.float32), nW).reshape(1, 1, HW))
        anc = np.asarray(self.anchors, np.float32).reshape(nA, self.anchor_step)
        aw_dev = jnp.asarray(anc[:, 0].reshape(1, nA, 1))
        ah_dev = jnp.asarray(anc[:, 1].reshape(1, nA, 1))

        # ---- Pallas kernel 1: decode -> packed pred boxes ----
        pred_packed = decode_pallas(act, gx_row, gy_row, aw_dev, ah_dev)

        # Single device->host transfer of the packed (4, N) slab.
        pred_boxes = np.asarray(pred_packed, dtype=np.float32).reshape(4, -1).T

        # ---- host-side target building ----
        (nGT, nCorrect, coord_mask, conf_mask, cls_mask,
         tx, ty, tw, th, tconf, tcls) = build_targets_np(
            pred_boxes, np.asarray(target, np.float32), self.anchors,
            nA, nC, nH, nW, self.noobject_scale, self.object_scale, self.thresh)
        del nGT, nCorrect  # logging-only in the reference

        conf_mask_sqrt = np.sqrt(conf_mask)

        def dev(a):
            return jnp.asarray(a.reshape(nB, nA, HW), jnp.float32)

        # ---- Pallas kernel 2: per-batch partial losses ----
        partials = loss_pallas(
            self.coord_scale, self.class_scale, nC, act,
            dev(tx), dev(ty), dev(tw), dev(th), dev(tconf),
            dev(coord_mask), dev(conf_mask_sqrt), dev(tcls), dev(cls_mask))

        sums = jnp.sum(partials[:, 0, :], axis=0)  # trivial final reduce
        loss_x, loss_y, loss_w, loss_h = sums[0], sums[1], sums[2], sums[3]
        loss_conf, loss_cls = sums[4], sums[5]
        self.n_proposals = sums[6]  # stays on device; logging-only in reference

        loss_box = loss_x + loss_y + loss_w + loss_h + loss_conf
        loss = loss_box + loss_cls

        self._last = dict(coord_mask=coord_mask, conf_mask=conf_mask,
                          cls_mask=cls_mask, tx=tx, ty=ty, tw=tw, th=th,
                          tconf=tconf, tcls=tcls, pred_boxes=pred_boxes)
        return loss, loss_cls, loss_box


# ----------------------------------------------------------------------------
# float64 NumPy reference (same build_targets outputs) for self-verification.
# ----------------------------------------------------------------------------
def _numpy_reference_losses(output_np, cache, rl):
    nB, ch, nH, nW = output_np.shape
    nA, nC = rl.num_anchors, rl.num_classes
    HW = nH * nW
    o = output_np.reshape(nB, nA, 5 + nC, HW).astype(np.float64)
    sig = lambda v: 1.0 / (1.0 + np.exp(-v))
    x, y = sig(o[:, :, 0]), sig(o[:, :, 1])
    w, h = o[:, :, 2], o[:, :, 3]
    conf = sig(o[:, :, 4])
    logits = o[:, :, 5:5 + nC]

    rs = lambda a: a.reshape(nB, nA, HW).astype(np.float64)
    cm = rs(cache['coord_mask'])
    cms = np.sqrt(rs(cache['conf_mask']))
    clm = rs(cache['cls_mask'])
    tx, ty = rs(cache['tx']), rs(cache['ty'])
    tw, th = rs(cache['tw']), rs(cache['th'])
    tconf = rs(cache['tconf'])
    tcls = rs(cache['tcls']).astype(np.int64)

    def sl1(a, b):
        d = (a - b) * cm
        ad = np.abs(d)
        return np.sum(np.where(ad < 1.0, 0.5 * d * d, ad - 0.5))

    lx = rl.coord_scale * sl1(x, tx) / 2.0
    ly = rl.coord_scale * sl1(y, ty) / 2.0
    lw = rl.coord_scale * sl1(w, tw) / 2.0
    lh = rl.coord_scale * sl1(h, th) / 2.0
    dconf = (conf - tconf) * cms
    lconf = np.sum(dconf * dconf) / 2.0

    m = logits.max(axis=2, keepdims=True)
    den = np.exp(logits - m).sum(axis=2)
    logit_t = np.take_along_axis(logits, tcls[:, :, None, :], axis=2)[:, :, 0, :]
    log_pt = logit_t - m[:, :, 0, :] - np.log(den)
    pt = np.exp(log_pt)
    lcls = rl.class_scale * np.sum(-(1.0 - pt) ** 2 * log_pt * clm)
    return np.array([lx, ly, lw, lh, lconf, lcls], dtype=np.float64)


# ----------------------------------------------------------------------------
if __name__ == "__main__":
    key = jax.random.PRNGKey(0)
    nB, nA, nC, nH, nW = 2, 5, 4, 16, 16
    anchors = [1.0, 1.2, 2.0, 2.2, 3.0, 3.2, 4.0, 4.2, 5.0, 5.2]

    output = 0.5 * jax.random.normal(key, (nB, nA * (5 + nC), nH, nW),
                                     dtype=jnp.float32)

    # target: (nB, 40*5) rows of [cls, cx, cy, w, h] (normalized), zero-padded
    target = np.zeros((nB, 200), dtype=np.float32)
    target[0, 0:5] = [1.0, 0.35, 0.45, 0.20, 0.30]
    target[0, 5:10] = [3.0, 0.70, 0.60, 0.15, 0.25]
    target[1, 0:5] = [0.0, 0.50, 0.50, 0.30, 0.40]

    region_loss = RegionLossPallas(anchors=anchors, num_anchors=nA,
                                   num_classes=nC, object_scale=5.0,
                                   noobject_scale=1.0, class_scale=1.0,
                                   coord_scale=1.0, thresh=0.4)

    loss, loss_cls, loss_box = region_loss.forward(output, target)
    jax.block_until_ready(loss)
    jax.block_until_ready(loss_cls)
    jax.block_until_ready(loss_box)

    assert np.isfinite(float(loss)), "loss is not finite"

    # Self-check against a float64 NumPy recomputation that reuses the same
    # build_targets outputs as the Pallas path.
    ref = _numpy_reference_losses(np.asarray(output), region_loss._last,
                                  region_loss)
    ref_box = float(ref[:5].sum())
    ref_cls = float(ref[5])
    np.testing.assert_allclose(float(loss_box), ref_box, rtol=1e-3, atol=1e-2)
    np.testing.assert_allclose(float(loss_cls), ref_cls, rtol=1e-3, atol=1e-2)
    np.testing.assert_allclose(float(loss), ref_box + ref_cls,
                               rtol=1e-3, atol=1e-2)
    print("KERNEL_OK")
</pallas_src>

<mosaic_0001>
module attributes {stable_mosaic.version = 11 : i64} {
  func.func @_decode_kernel(%arg0: i32, %arg1: memref<1x5x8x256xf32, #tpu.memory_space<vmem>>, %arg2: memref<1x1x256xf32, #tpu.memory_space<vmem>>, %arg3: memref<1x1x256xf32, #tpu.memory_space<vmem>>, %arg4: memref<1x5x1xf32, #tpu.memory_space<vmem>>, %arg5: memref<1x5x1xf32, #tpu.memory_space<vmem>>, %arg6: memref<4x1x5x256xf32, #tpu.memory_space<vmem>>) attributes {dimension_semantics = [#tpu.dimension_semantics<parallel>], iteration_bounds = array<i64: 2>, scalar_prefetch = 0 : i64, scratch_operands = 0 : i64, tpu.core_type = #tpu.core_type<tc>, window_params = [{transform_indices = @transform_0, window_bounds = array<i64: 1, 5, 8, 256>}, {pipeline_mode = #tpu.pipeline_mode<synchronous>, transform_indices = @transform_1, window_bounds = array<i64: 1, 1, 256>}, {pipeline_mode = #tpu.pipeline_mode<synchronous>, transform_indices = @transform_2, window_bounds = array<i64: 1, 1, 256>}, {pipeline_mode = #tpu.pipeline_mode<synchronous>, transform_indices = @transform_3, window_bounds = array<i64: 1, 5, 1>}, {pipeline_mode = #tpu.pipeline_mode<synchronous>, transform_indices = @transform_4, window_bounds = array<i64: 1, 5, 1>}, {transform_indices = @transform_5, window_bounds = array<i64: 4, 1, 5, 256>}]} {
    %c0 = arith.constant 0 : index
    %c0_0 = arith.constant 0 : index
    %c0_1 = arith.constant 0 : index
    %c0_2 = arith.constant 0 : index
    %0 = vector.load %arg1[%c0, %c0_0, %c0_1, %c0_2] : memref<1x5x8x256xf32, #tpu.memory_space<vmem>>, vector<1x5x1x256xf32>
    %1 = vector.shape_cast %0 : vector<1x5x1x256xf32> to vector<1x5x256xf32>
    %c0_3 = arith.constant 0 : index
    %c0_4 = arith.constant 0 : index
    %c1 = arith.constant 1 : index
    %c0_5 = arith.constant 0 : index
    %2 = vector.load %arg1[%c0_3, %c0_4, %c1, %c0_5] : memref<1x5x8x256xf32, #tpu.memory_space<vmem>>, vector<1x5x1x256xf32>
    %3 = vector.shape_cast %2 : vector<1x5x1x256xf32> to vector<1x5x256xf32>
    %c0_6 = arith.constant 0 : index
    %c0_7 = arith.constant 0 : index
    %c2 = arith.constant 2 : index
    %c0_8 = arith.constant 0 : index
    %4 = vector.load %arg1[%c0_6, %c0_7, %c2, %c0_8] : memref<1x5x8x256xf32, #tpu.memory_space<vmem>>, vector<1x5x1x256xf32>
    %5 = vector.shape_cast %4 : vector<1x5x1x256xf32> to vector<1x5x256xf32>
    %c0_9 = arith.constant 0 : index
    %c0_10 = arith.constant 0 : index
    %c3 = arith.constant 3 : index
    %c0_11 = arith.constant 0 : index
    %6 = vector.load %arg1[%c0_9, %c0_10, %c3, %c0_11] : memref<1x5x8x256xf32, #tpu.memory_space<vmem>>, vector<1x5x1x256xf32>
    %7 = vector.shape_cast %6 : vector<1x5x1x256xf32> to vector<1x5x256xf32>
    %cst = arith.constant 0.000000e+00 : f32
    %8 = vector.broadcast %cst : f32 to vector<1x5x256xf32>
    %9 = arith.subf %8, %1 : vector<1x5x256xf32>
    %10 = math.exp %9 : vector<1x5x256xf32>
    %cst_12 = arith.constant 1.000000e+00 : f32
    %11 = vector.broadcast %cst_12 : f32 to vector<1x5x256xf32>
    %12 = arith.addf %11, %10 : vector<1x5x256xf32>
    %cst_13 = arith.constant 1.000000e+00 : f32
    %13 = vector.broadcast %cst_13 : f32 to vector<1x5x256xf32>
    %14 = arith.divf %13, %12 : vector<1x5x256xf32>
    %cst_14 = arith.constant 0.000000e+00 : f32
    %15 = vector.broadcast %cst_14 : f32 to vector<1x5x256xf32>
    %16 = arith.subf %15, %3 : vector<1x5x256xf32>
    %17 = math.exp %16 : vector<1x5x256xf32>
    %cst_15 = arith.constant 1.000000e+00 : f32
    %18 = vector.broadcast %cst_15 : f32 to vector<1x5x256xf32>
    %19 = arith.addf %18, %17 : vector<1x5x256xf32>
    %cst_16 = arith.constant 1.000000e+00 : f32
    %20 = vector.broadcast %cst_16 : f32 to vector<1x5x256xf32>
    %21 = arith.divf %20, %19 : vector<1x5x256xf32>
    %c0_17 = arith.constant 0 : index
    %c0_18 = arith.constant 0 : index
    %c0_19 = arith.constant 0 : index
    %22 = vector.load %arg2[%c0_17, %c0_18, %c0_19] : memref<1x1x256xf32, #tpu.memory_space<vmem>>, vector<1x1x256xf32>
    %23 = vector.broadcast %22 : vector<1x1x256xf32> to vector<1x5x256xf32>
    %24 = arith.addf %14, %23 : vector<1x5x256xf32>
    %c0_20 = arith.constant 0 : index
    %c0_21 = arith.constant 0 : index
    %c0_22 = arith.constant 0 : index
    %c0_23 = arith.constant 0 : index
    %25 = vector.load %arg6[%c0_20, %c0_21, %c0_22, %c0_23] : memref<4x1x5x256xf32, #tpu.memory_space<vmem>>, vector<1x1x5x256xf32>
    %26 = vector.shape_cast %25 : vector<1x1x5x256xf32> to vector<1x5x256xf32>
    %27 = vector.shape_cast %24 : vector<1x5x256xf32> to vector<1x1x5x256xf32>
    tpu.vector_store %arg6[%c0_20, %c0_21, %c0_22, %c0_23], %27 {strides = array<i32>} : memref<4x1x5x256xf32, #tpu.memory_space<vmem>>, vector<1x1x5x256xf32>,
    %c0_24 = arith.constant 0 : index
    %c0_25 = arith.constant 0 : index
    %c0_26 = arith.constant 0 : index
    %28 = vector.load %arg3[%c0_24, %c0_25, %c0_26] : memref<1x1x256xf32, #tpu.memory_space<vmem>>, vector<1x1x256xf32>
    %29 = vector.broadcast %28 : vector<1x1x256xf32> to vector<1x5x256xf32>
    %30 = arith.addf %21, %29 : vector<1x5x256xf32>
    %c1_27 = arith.constant 1 : index
    %c0_28 = arith.constant 0 : index
    %c0_29 = arith.constant 0 : index
    %c0_30 = arith.constant 0 : index
    %31 = vector.load %arg6[%c1_27, %c0_28, %c0_29, %c0_30] : memref<4x1x5x256xf32, #tpu.memory_space<vmem>>, vector<1x1x5x256xf32>
    %32 = vector.shape_cast %31 : vector<1x1x5x256xf32> to vector<1x5x256xf32>
    %33 = vector.shape_cast %30 : vector<1x5x256xf32> to vector<1x1x5x256xf32>
    tpu.vector_store %arg6[%c1_27, %c0_28, %c0_29, %c0_30], %33 {strides = array<i32>} : memref<4x1x5x256xf32, #tpu.memory_space<vmem>>, vector<1x1x5x256xf32>,
    %34 = math.exp %5 : vector<1x5x256xf32>
    %c0_31 = arith.constant 0 : index
    %c0_32 = arith.constant 0 : index
    %c0_33 = arith.constant 0 : index
    %35 = vector.load %arg4[%c0_31, %c0_32, %c0_33] : memref<1x5x1xf32, #tpu.memory_space<vmem>>, vector<1x5x1xf32>
    %36 = vector.broadcast %35 : vector<1x5x1xf32> to vector<1x5x256xf32>
    %37 = arith.mulf %34, %36 : vector<1x5x256xf32>
    %c2_34 = arith.constant 2 : index
    %c0_35 = arith.constant 0 : index
    %c0_36 = arith.constant 0 : index
    %c0_37 = arith.constant 0 : index
    %38 = vector.load %arg6[%c2_34, %c0_35, %c0_36, %c0_37] : memref<4x1x5x256xf32, #tpu.memory_space<vmem>>, vector<1x1x5x256xf32>
    %39 = vector.shape_cast %38 : vector<1x1x5x256xf32> to vector<1x5x256xf32>
    %40 = vector.shape_cast %37 : vector<1x5x256xf32> to vector<1x1x5x256xf32>
    tpu.vector_store %arg6[%c2_34, %c0_35, %c0_36, %c0_37], %40 {strides = array<i32>} : memref<4x1x5x256xf32, #tpu.memory_space<vmem>>, vector<1x1x5x256xf32>,
    %41 = math.exp %7 : vector<1x5x256xf32>
    %c0_38 = arith.constant 0 : index
    %c0_39 = arith.constant 0 : index
    %c0_40 = arith.constant 0 : index
    %42 = vector.load %arg5[%c0_38, %c0_39, %c0_40] : memref<1x5x1xf32, #tpu.memory_space<vmem>>, vector<1x5x1xf32>
    %43 = vector.broadcast %42 : vector<1x5x1xf32> to vector<1x5x256xf32>
    %44 = arith.mulf %41, %43 : vector<1x5x256xf32>
    %c3_41 = arith.constant 3 : index
    %c0_42 = arith.constant 0 : index
    %c0_43 = arith.constant 0 : index
    %c0_44 = arith.constant 0 : index
    %45 = vector.load %arg6[%c3_41, %c0_42, %c0_43, %c0_44] : memref<4x1x5x256xf32, #tpu.memory_space<vmem>>, vector<1x1x5x256xf32>
    %46 = vector.shape_cast %45 : vector<1x1x5x256xf32> to vector<1x5x256xf32>
    %47 = vector.shape_cast %44 : vector<1x5x256xf32> to vector<1x1x5x256xf32>
    tpu.vector_store %arg6[%c3_41, %c0_42, %c0_43, %c0_44], %47 {strides = array<i32>} : memref<4x1x5x256xf32, #tpu.memory_space<vmem>>, vector<1x1x5x256xf32>,
    return
  }
  func.func @transform_0(%arg0: i32) -> (i32, i32, i32, i32) {
    %c0_i32 = arith.constant 0 : i32
    %c0_i32_0 = arith.constant 0 : i32
    %c0_i32_1 = arith.constant 0 : i32
    %c0_i32_2 = arith.constant 0 : i32
    return %arg0, %c0_i32, %c0_i32_0, %c0_i32_1 : i32, i32, i32, i32
  }
  func.func @transform_1(%arg0: i32) -> (i32, i32, i32) {
    %c0_i32 = arith.constant 0 : i32
    %c0_i32_0 = arith.constant 0 : i32
    %c0_i32_1 = arith.constant 0 : i32
    %c0_i32_2 = arith.constant 0 : i32
    return %c0_i32, %c0_i32_0, %c0_i32_1 : i32, i32, i32
  }
  func.func @transform_2(%arg0: i32) -> (i32, i32, i32) {
    %c0_i32 = arith.constant 0 : i32
    %c0_i32_0 = arith.constant 0 : i32
    %c0_i32_1 = arith.constant 0 : i32
    %c0_i32_2 = arith.constant 0 : i32
    return %c0_i32, %c0_i32_0, %c0_i32_1 : i32, i32, i32
  }
  func.func @transform_3(%arg0: i32) -> (i32, i32, i32) {
    %c0_i32 = arith.constant 0 : i32
    %c0_i32_0 = arith.constant 0 : i32
    %c0_i32_1 = arith.constant 0 : i32
    %c0_i32_2 = arith.constant 0 : i32
    return %c0_i32, %c0_i32_0, %c0_i32_1 : i32, i32, i32
  }
  func.func @transform_4(%arg0: i32) -> (i32, i32, i32) {
    %c0_i32 = arith.constant 0 : i32
    %c0_i32_0 = arith.constant 0 : i32
    %c0_i32_1 = arith.constant 0 : i32
    %c0_i32_2 = arith.constant 0 : i32
    return %c0_i32, %c0_i32_0, %c0_i32_1 : i32, i32, i32
  }
  func.func @transform_5(%arg0: i32) -> (i32, i32, i32, i32) {
    %c0_i32 = arith.constant 0 : i32
    %c0_i32_0 = arith.constant 0 : i32
    %c0_i32_1 = arith.constant 0 : i32
    %c0_i32_2 = arith.constant 0 : i32
    return %c0_i32, %arg0, %c0_i32_0, %c0_i32_1 : i32, i32, i32, i32
  }
}

</mosaic_0001>

<bundles_post_ra>
// kernel: tpu_custom_call.1
= control target key start
LH: loop header
LB: loop body
LE: loop exit
PB: predicated region body
PF: predicated region fallthrough
CT: control target
= control target key end

     0   :  { %s961_s18 = smov 0   ;;  %s963_s19 = smov 0   ;;  %s1364_s0 = inlined_call_operand.vmem [shape: f32[2,5,9,256], index: 0, kind: input, shape index: {}]   ;;  %s1365_s1 = inlined_call_operand.vmem [shape: f32[1,1,256], index: 1, kind: input, shape index: {}]   ;;  %s1366_s2 = inlined_call_operand.vmem [shape: f32[1,1,256], index: 2, kind: input, shape index: {}]   ;;  %s1367_s3 = inlined_call_operand.vmem [shape: f32[1,5,1], index: 3, kind: input, shape index: {}]   ;;  %s1368_s4 = inlined_call_operand.vmem [shape: f32[1,5,1], index: 4, kind: input, shape index: {}]   ;;  %s1369_s5 = inlined_call_operand.vmem [shape: f32[4,2,5,256], index: 5, kind: output, shape index: {}]  }
   0x1   :  { %s965_s20 = smov 0  }
   0x2 LB: > { %s779_s21 = sadd.s32 4294967295, %s928_s20   ;;  %s978_s22 = sadd.s32 1, %s928_s20   ;;  %s928_s20 = sphi %s965_s20, %s1409_s20   ;;  %s924_s19 = sphi %s963_s19, %s1408_s19   ;;  %s920_s18 = sphi %s961_s18, %s1407_s18  }
   0x3   : > { %s19_s23 = ssub.s32 %s928_s20, %s978_s22  ;;  %s22_s24 = sadd.s32 1, %s924_s19 }
   0x4   : > { %p20_p0 = scmp.eq.s32.totalorder %s19_s23, 0  ;;  %p29_p1 = scmp.ne.s32.totalorder %s924_s19, %s920_s18 }
   0x5   : > { %p30_p2 = scmp.eq.s32.totalorder %s928_s20, 0  ;;  %p143_p3 = scmp.eq.s32.totalorder %s779_s21, 1 }
   0x6   : > { %s989_s25 = scalar_select %p20_p0, %s924_s19, %s22_s24  }
   0x7   : > { %p31_p4 = por %p30_p2, %p29_p1  ;;  %p991_p5 = por %p143_p3, %p29_p1 }
   0x8   : > { %p782_p6 = scmp.ge.s32.totalorder %s928_s20, 2 }
   0xa   : > { %177 = sbr.rel (%p782_p6) target bundleno = 30 (0x1e), region = 32 }
   0xf   : > { %180 = sbr.rel (!%p31_p4) target bundleno = 30 (0x1e), region = 36  ;;  %s182_s27 = sand.u32 (%p31_p4), 1, %s924_s19  }
  0x10   : > { %s818_s28 = smul.u32 (%p31_p4), 160, %s928_s20 }
  0x11   : > { %s817_s29 = smul.u32 (%p31_p4), 80, %s182_s27 }
  0x12   : > { %s187_s7 = scalar_lea.vmem (%p31_p4), %s1364_s0, %s818_s28 }
  0x13   : > { %v200_v0 = vld [vmem:[%s187_s7] sm:$0xff] (%p31_p4)  ;;  %v202_v1 = vld [vmem:[%s187_s7 + $0x8] sm:$0xff] (%p31_p4)  ;;  %s184_s8 = scalar_lea.vmem (%p31_p4), [#allocation2], %s817_s29 }
  0x14   : > { %v204_v2 = vld [vmem:[%s187_s7 + $0x20] sm:$0xff]  ;;  %201 = vst [vmem:[%s184_s8] sm:$0xff] %v200_v0  ;;  %v206_v3 = vld [vmem:[%s187_s7 + $0x28] sm:$0xff] }
  0x15   : > { %203 = vst [vmem:[%s184_s8 + $0x8] sm:$0xff] %v202_v1  ;;  %v208_v4 = vld [vmem:[%s187_s7 + $0x40] sm:$0xff]  ;;  %v210_v5 = vld [vmem:[%s187_s7 + $0x48] sm:$0xff] }
  0x16   : > { %205 = vst [vmem:[%s184_s8 + $0x10] sm:$0xff] %v204_v2  ;;  %v212_v6 = vld [vmem:[%s187_s7 + $0x60] sm:$0xff]  ;;  %v214_v7 = vld [vmem:[%s187_s7 + $0x68] sm:$0xff] }
  0x17   : > { %207 = vst [vmem:[%s184_s8 + $0x18] sm:$0xff] %v206_v3  ;;  %v216_v8 = vld [vmem:[%s187_s7 + $0x80] sm:$0xff]  ;;  %v218_v9 = vld [vmem:[%s187_s7 + $0x88] sm:$0xff] }
  0x18   : > { %209 = vst [vmem:[%s184_s8 + $0x20] sm:$0xff] %v208_v4 }
  0x19   : > { %211 = vst [vmem:[%s184_s8 + $0x28] sm:$0xff] %v210_v5 }
  0x1a   : > { %213 = vst [vmem:[%s184_s8 + $0x30] sm:$0xff] %v212_v6 }
  0x1b   : > { %215 = vst [vmem:[%s184_s8 + $0x38] sm:$0xff] %v214_v7 }
  0x1c   : > { %217 = vst [vmem:[%s184_s8 + $0x40] sm:$0xff] %v216_v8 }
  0x1d   : > { %219 = vst [vmem:[%s184_s8 + $0x48] sm:$0xff] %v218_v9 }
  0x1e PF: > { %p784_p7 = scmp.ge.s32.totalorder %s928_s20, 1  ;;  %p224_p8 = scmp.lt.s32.totalorder %s928_s20, 3 }
  0x20   : > { %p225_p9 = pnand %p784_p7, %p224_p8 }
  0x21   : > { %s231_s13 = sand.u32 (!%p225_p9), 1, %s920_s18  }
  0x22   : > { %228 = sbr.rel (%p225_p9) target bundleno = 196 (0xc4), region = 59  ;;  %s785_s27 = sshll.u32 (!%p225_p9), %s231_s13, 6 }
  0x23   : > { %s819_s14 = smul.u32 (!%p225_p9), 80, %s231_s13  ;;  %s1324_s18 = scalar_lea.vmem (!%p225_p9), [#allocation3], %s785_s27 }
  0x25   : > { %s1012_s15 = scalar_lea.vmem (!%p225_p9), [#allocation2], %s819_s14 }
  0x27   : > { %v590_v10 = vld [vmem:[%s1367_s3] sm:$0x1f]  ;;  %v930_v11 = vmov 0   ;;  %s816_s28 = sshll.u32 (%p991_p5), %s779_s21, 4 }
  0x28   : > { %845 = vset.pattern.permute.xlu0 %v930_v11  ;;  %v641_v12 = vld [vmem:[%s1368_s4] sm:$0x1f]  ;;  %s691_s6 = scalar_lea.vmem (%p991_p5), %s1369_s5, %s816_s28 }
  0x29   : > { %593 = vperm.xlu0 %845, %v590_v10   ;;  %v257_v13 = vld [vmem:[%s1012_s15] ss:$8 sm:$0x3]  ;;  %v786_v14 = vld [vmem:[%s1012_s15 + $0x10] ss:$8 sm:$0x3] }
  0x2a   : > { %v787_v15 = vld [vmem:[%s1012_s15 + $0x20] ss:$8 sm:$0x3]  ;;  %v788_v16 = vld [vmem:[%s1012_s15 + $0x30] ss:$8 sm:$0x3] }
  0x2b   : > { %v296_v17 = vsub.f32 0.0, %v257_v13  ;;  %v297_v18 = vsub.f32 0.0, %v786_v14  ;;  %v298_v19 = vsub.f32 0.0, %v787_v15  ;;  %v789_v20 = vld [vmem:[%s1012_s15 + $0x40] ss:$8 sm:$0x3] }
  0x2c   : > { %v299_v21 = vsub.f32 0.0, %v788_v16  ;;  %v300_v26 = vsub.f32 0.0, %v789_v20  ;;  %v790_v27 = vld [vmem:[%s1012_s15 + $0x1] ss:$8 sm:$0x3] }
  0x2d   : > { %v301_v22 = vmul.f32 1.442695, %v296_v17  ;;  %v303_v23 = vmul.f32 1.442695, %v297_v18  ;;  %v305_v24 = vmul.f32 1.442695, %v298_v19 }
  0x2e   : > { %v307_v25 = vmul.f32 1.442695, %v299_v21  ;;  %v309_v28 = vmul.f32 1.442695, %v300_v26  ;;  %v391_v29 = vsub.f32 0.0, %v790_v27 }
  0x2f   : > { %846 = vpow2.f32 %v301_v22  ;;  %v791_v38 = vld [vmem:[%s1012_s15 + $0x11] ss:$8 sm:$0x3]  ;;  %v792_v39 = vld [vmem:[%s1012_s15 + $0x21] ss:$8 sm:$0x3] }
  0x30   : > { %848 = vpow2.f32 %v303_v23  ;;  %v396_v35 = vmul.f32 1.442695, %v391_v29  ;;  %v793_v41 = vld [vmem:[%s1012_s15 + $0x31] ss:$8 sm:$0x3]  ;;  %v392_v43 = vsub.f32 0.0, %v791_v38 }
  0x31   : > { %644 = vperm.xlu0 %845, %v641_v12   ;;  %850 = vpow2.f32 %v305_v24  ;;  %v794_v45 = vld [vmem:[%s1012_s15 + $0x41] ss:$8 sm:$0x3]  ;;  %v393_v46 = vsub.f32 0.0, %v792_v39  ;;  %v394_v47 = vsub.f32 0.0, %v793_v41 }
  0x32   : > { %852 = vpow2.f32 %v307_v25  ;;  %v395_v52 = vsub.f32 0.0, %v794_v45  ;;  %v398_v53 = vmul.f32 1.442695, %v392_v43 }
  0x33   : > { %854 = vpow2.f32 %v309_v28  ;;  %v400_v55 = vmul.f32 1.442695, %v393_v46  ;;  %v402_v57 = vmul.f32 1.442695, %v394_v47  ;;  %v486_v47 = vld [vmem:[%s1365_s1] sm:$0x3] }
  0x34   : > { %v404_v62 = vmul.f32 1.442695, %v395_v52 }
  0x35   : > { %v847_v30 = vpop.eup %846 }
  0x36   : > { %v849_v31 = vpop.eup %848  ;;  %v1020_v32 = vadd.f32 1.0, %v847_v30 }
  0x37   : > { %v851_v33 = vpop.eup %850  ;;  %v1022_v34 = vadd.f32 1.0, %v849_v31 }
  0x38   : > { %v853_v36 = vpop.eup %852  ;;  %v1024_v37 = vadd.f32 1.0, %v851_v33  ;;  %856 = vrcp.f32 %v1020_v32  ;;  %v325_v4 = vand.u32 2147483647, %v1020_v32  ;;  %v327_v5 = vand.u32 2147483648, %v1020_v32 }
  0x39   : > { %858 = vrcp.f32 %v1022_v34  ;;  %v1030_v40 = vadd.f32 1.0, %v853_v36  ;;  %v855_v42 = vpop.eup %854  ;;  %vm321_vm0 = vweird.f32 %v1020_v32  ;;  %v342_v9 = vand.u32 2147483648, %v1022_v34 }
  0x3a   : > { %860 = vpow2.f32 %v396_v35  ;;  %v1040_v49 = vadd.f32 1.0, %v855_v42  ;;  %vm1073_vm2 = vcmp.eq.f32.partialorder %v325_v4, 8.507059e+37  ;;  %v328_v17 = vor.u32 1.1754944e-38, %v327_v5 }
  0x3b   : > { %862 = vrcp.f32 %v1024_v37  ;;  %vm336_vm3 = vweird.f32 %v1022_v34  ;;  %v340_v20 = vand.u32 2147483647, %v1022_v34  ;;  %vm351_vm5 = vweird.f32 %v1024_v37 }
  0x3c   : > { %864 = vrcp.f32 %v1030_v40  ;;  %v355_v22 = vand.u32 2147483647, %v1024_v37  ;;  %v357_v31 = vand.u32 2147483648, %v1024_v37  ;;  %vm366_vm9 = vweird.f32 %v1030_v40 }
  0x3d   : > { %866 = vrcp.f32 %v1040_v49  ;;  %v372_v36 = vand.u32 2147483648, %v1030_v40  ;;  %v370_v41 = vand.u32 2147483647, %v1030_v40  ;;  %vm1128_vm12 = vcmp.eq.f32.partialorder %v340_v20, 8.507059e+37 }
  0x3e   : > { %v1034_v44 = vpop.eup %856  ;;  %868 = vpow2.f32 %v398_v53  ;;  %vm1141_vm14 = vcmp.eq.f32.partialorder %v355_v22, 8.507059e+37  ;;  %v358_v46 = vor.u32 1.1754944e-38, %v357_v31  ;;  %vm381_vm15 = vweird.f32 %v1040_v49 }
  0x3f   : > { %v1038_v48 = vpop.eup %858  ;;  %v317_v51 = vmul.f32 %v1034_v44, %v1020_v32  ;;  %870 = vpow2.f32 %v400_v55  ;;  %vm322_vm1 = vweird.f32 %v1034_v44  ;;  %v387_v52 = vand.u32 2147483648, %v1040_v49 }
  0x40   : > { %v861_v50 = vpop.eup %860  ;;  %v332_v56 = vmul.f32 %v1038_v48, %v1022_v34  ;;  %872 = vpow2.f32 %v402_v57  ;;  %vm337_vm4 = vweird.f32 %v1038_v48  ;;  %vm1085_vm7 = vmor %vm321_vm0, %vm322_vm1  ;;  %v343_v34 = vor.u32 1.1754944e-38, %v342_v9 }
  0x41   : > { %v1044_v54 = vpop.eup %862  ;;  %v1049_v58 = vadd.f32 1.0, %v861_v50  ;;  %v318_v60 = vsub.f32 1.0, %v317_v51  ;;  %vm1095_vm8 = vmor %vm336_vm3, %vm337_vm4  ;;  %v385_v50 = vand.u32 2147483647, %v1040_v49  ;;  %vm371_vm1 = vcmp.eq.f32.partialorder %v370_v41, 8.507059e+37 }
  0x42   : > { %v1051_v59 = vpop.eup %864  ;;  %v347_v61 = vmul.f32 %v1044_v54, %v1024_v37  ;;  %v333_v63 = vsub.f32 1.0, %v332_v56  ;;  %vm352_vm6 = vweird.f32 %v1044_v54  ;;  %v489_v57 = vperm.slane %v486_v47, 1 }
  0x43   : > { %v362_v0 = vmul.f32 %v1051_v59, %v1030_v40  ;;  %874 = vrcp.f32 %v1049_v58  ;;  %v319_v1 = vmul.f32 %v1034_v44, %v318_v60  ;;  %v1059_v3 = vpop.eup %866  ;;  %vm367_vm10 = vweird.f32 %v1051_v59  ;;  %vm1116_vm11 = vmor %vm351_vm5, %vm352_vm6 }
  0x44   : > { %v348_v2 = vsub.f32 1.0, %v347_v61  ;;  %876 = vpow2.f32 %v404_v62  ;;  %v869_v6 = vpop.eup %868  ;;  %v334_v7 = vmul.f32 %v1038_v48, %v333_v63  ;;  %v377_v14 = vmul.f32 %v1059_v3, %v1040_v49  ;;  %vm1132_vm13 = vmor %vm366_vm9, %vm367_vm10 }
  0x45   : > { %v871_v8 = vpop.eup %870  ;;  %v363_v10 = vsub.f32 1.0, %v362_v0  ;;  %v320_v12 = vadd.f32 %v1034_v44, %v319_v1  ;;  %v1091_v24 = vadd.f32 1.0, %v869_v6  ;;  %vm382_vm0 = vweird.f32 %v1059_v3 }
  0x46   : > { %v873_v11 = vpop.eup %872  ;;  %v349_v13 = vmul.f32 %v1044_v54, %v348_v2  ;;  %v335_v19 = vadd.f32 %v1038_v48, %v334_v7  ;;  %v1093_v25 = vadd.f32 1.0, %v871_v8  ;;  %v378_v28 = vsub.f32 1.0, %v377_v14  ;;  %vm1168_vm3 = vmor %vm381_vm15, %vm382_vm0 }
  0x47   : > { %v364_v23 = vmul.f32 %v1051_v59, %v363_v10  ;;  %v1100_v29 = vadd.f32 1.0, %v873_v11  ;;  %v324_v33 = vsel %vm1085_vm7, %v1034_v44, %v320_v12  ;;  %878 = vrcp.f32 %v1091_v24 }
  0x48   : > { %v350_v27 = vadd.f32 %v1044_v54, %v349_v13  ;;  %v339_v38 = vsel %vm1095_vm8, %v1038_v48, %v335_v19  ;;  %880 = vrcp.f32 %v1093_v25  ;;  %v379_v43 = vmul.f32 %v1059_v3, %v378_v28 }
  0x49   : > { %v1071_v15 = vpop.eup %874  ;;  %v365_v39 = vadd.f32 %v1051_v59, %v364_v23  ;;  %882 = vrcp.f32 %v1100_v29  ;;  %v373_v48 = vor.u32 1.1754944e-38, %v372_v36  ;;  %v344_v61 = vsel %vm1128_vm12, %v343_v34, %v339_v38 }
  0x4a   : > { %v877_v18 = vpop.eup %876  ;;  %v412_v30 = vmul.f32 %v1071_v15, %v1049_v58  ;;  %v354_v45 = vsel %vm1116_vm11, %v1044_v54, %v350_v27  ;;  %v329_v54 = vsel %vm1073_vm2, %v328_v17, %v324_v33  ;;  %v380_v55 = vadd.f32 %v1059_v3, %v379_v43 }
  0x4b   : > { %v1107_v32 = vadd.f32 1.0, %v877_v18  ;;  %v369_v51 = vsel %vm1132_vm13, %v1051_v59, %v365_v39  ;;  %v359_v59 = vsel %vm1141_vm14, %v358_v46, %v354_v45  ;;  %vm416_vm4 = vweird.f32 %v1049_v58  ;;  %v535_v39 = vld [vmem:[%s1366_s2] sm:$0x3] }
  0x4c   : > { %v413_v44 = vsub.f32 1.0, %v412_v30  ;;  %v422_v62 = vand.u32 2147483648, %v1049_v58  ;;  %v374_v0 = vsel %vm371_vm1, %v373_v48, %v369_v51  ;;  %vm1176_vm2 = vcmp.eq.f32.partialorder %v385_v50, 8.507059e+37 }
  0x4d   : > { %884 = vrcp.f32 %v1107_v32  ;;  %v1156_v53 = vpop.eup %878  ;;  %vm417_vm5 = vweird.f32 %v1071_v15  ;;  %v420_v2 = vand.u32 2147483647, %v1049_v58  ;;  %v388_v5 = vor.u32 1.1754944e-38, %v387_v52 }
  0x4e   : > { %v414_v56 = vmul.f32 %v1071_v15, %v413_v44  ;;  %v1162_v60 = vpop.eup %880  ;;  %v427_v6 = vmul.f32 %v1156_v53, %v1091_v24  ;;  %v435_v7 = vand.u32 2147483647, %v1091_v24  ;;  %v488_v8 = vperm.slane %v486_v47, 0  ;;  %vm1199_vm6 = vmor %vm416_vm4, %vm417_vm5 }
  0x4f   : > { %v1174_v63 = vpop.eup %882  ;;  %v384_v9 = vsel %vm1168_vm3, %v1059_v3, %v380_v55  ;;  %v442_v11 = vmul.f32 %v1162_v60, %v1093_v25  ;;  %v423_v14 = vor.u32 1.1754944e-38, %v422_v62  ;;  %vm431_vm7 = vweird.f32 %v1091_v24 }
  0x50   : > { %v1191_v10 = vadd.f32 %v1071_v15, %v414_v56  ;;  %v457_v12 = vmul.f32 %v1174_v63, %v1100_v29  ;;  %v437_v3 = vand.u32 2147483648, %v1091_v24  ;;  %v490_v16 = vrot.slane %v489_v57, 7 }
  0x51   : > { %vm493_vm8 = vcmask 1041409   ;;  %vm1205_vm9 = vcmp.eq.f32.partialorder %v420_v2, 8.507059e+37  ;;  %vm446_vm10 = vweird.f32 %v1093_v25  ;;  %vm491_vm11 = vcmask 1040384  }
  0x52   : > { %vm496_vm12 = vcmask 1042434   ;;  %v389_v18 = vsel %vm1176_vm2, %v388_v5, %v384_v9  ;;  %v428_v19 = vsub.f32 1.0, %v427_v6  ;;  %vm461_vm13 = vweird.f32 %v1100_v29 }
  0x53   : > { %v1182_v4 = vpop.eup %884  ;;  %v494_v20 = vsel %vm493_vm8, %v488_v8, %v490_v16  ;;  %v497_v21 = vsel %vm496_vm12, %v488_v8, %v490_v16  ;;  %v419_v22 = vsel %vm1199_vm6, %v1071_v15, %v1191_v10  ;;  %v443_v23 = vsub.f32 1.0, %v442_v11 }
  0x54   : > { %v472_v58 = vmul.f32 %v1182_v4, %v1107_v32  ;;  %v450_v26 = vand.u32 2147483647, %v1093_v25  ;;  %v458_v27 = vsub.f32 1.0, %v457_v12  ;;  %vm476_vm14 = vweird.f32 %v1107_v32 }
  0x55   : > { %v492_v28 = vsel %vm491_vm11, %v488_v8, %v490_v16  ;;  %v495_v30 = vrot.slane %v494_v20, 1  ;;  %v498_v31 = vrot.slane %v497_v21, 2  ;;  %vm499_vm15 = vcmask 1043459   ;;  %v797_v20 = vld [vmem:[%s1012_s15 + $0x22] ss:$8 sm:$0x3] }
  0x56   : > { %v452_v33 = vand.u32 2147483648, %v1093_v25  ;;  %v473_v34 = vsub.f32 1.0, %v472_v58  ;;  %v500_v35 = vsel %vm499_vm15, %v488_v8, %v490_v16  ;;  %vm502_vm0 = vcmask 1044484   ;;  %v796_v58 = vld [vmem:[%s1012_s15 + $0x12] ss:$8 sm:$0x3] }
  0x57   : > { %v429_v36 = vmul.f32 %v1156_v53, %v428_v19  ;;  %vm432_vm1 = vweird.f32 %v1156_v53  ;;  %v501_v15 = vrot.slane %v500_v35, 3  ;;  %v503_v38 = vsel %vm502_vm0, %v488_v8, %v490_v16  ;;  %v799_v35 = vld [vmem:[%s1012_s15 + $0x42] ss:$8 sm:$0x3] }
  0x58   : > { %v444_v41 = vmul.f32 %v1162_v60, %v443_v23  ;;  %vm447_vm3 = vweird.f32 %v1162_v60  ;;  %v504_v37 = vrot.slane %v503_v38, 4  ;;  %v510_v42 = vadd.f32 %v492_v28, %v329_v54  ;;  %vm1244_vm2 = vmor %vm431_vm7, %vm432_vm1 }
  0x59   : > { %v459_v43 = vmul.f32 %v1174_v63, %v458_v27  ;;  %v511_v44 = vadd.f32 %v495_v30, %v344_v61  ;;  %v512_v45 = vadd.f32 %v498_v31, %v359_v59  ;;  %v513_v40 = vadd.f32 %v501_v15, %v374_v0  ;;  %vm1263_vm7 = vmor %vm446_vm10, %vm447_vm3 }
  0x5a   : > { %v474_v46 = vmul.f32 %v1182_v4, %v473_v34  ;;  %v514_v47 = vadd.f32 %v504_v37, %v389_v18  ;;  %520 = vst [vmem:[#allocation1] ss:$9 sm:$0xff] %v510_v42  ;;  %v537_v48 = vperm.slane %v535_v39, 0  ;;  %v538_v50 = vperm.slane %v535_v39, 1 }
  0x5b   : > { %v430_v51 = vadd.f32 %v1156_v53, %v429_v36  ;;  %vm462_vm4 = vweird.f32 %v1174_v63  ;;  %v465_v52 = vand.u32 2147483647, %v1100_v29  ;;  %v467_v55 = vand.u32 2147483648, %v1100_v29  ;;  %522 = vst [vmem:[#allocation1 + $0x1] ss:$9 sm:$0xff] %v511_v44 }
  0x5c   : > { %v445_v56 = vadd.f32 %v1162_v60, %v444_v41  ;;  %vm477_vm5 = vweird.f32 %v1182_v4  ;;  %v482_v57 = vand.u32 2147483648, %v1107_v32  ;;  %524 = vst [vmem:[#allocation1 + $0x2] ss:$9 sm:$0xff] %v512_v45  ;;  %v539_v61 = vrot.slane %v538_v50, 7  ;;  %vm1276_vm1 = vmor %vm461_vm13, %vm462_vm4 }
  0x5d   : > { %v424_v59 = vsel %vm1205_vm9, %v423_v14, %v419_v22  ;;  %vm1255_vm6 = vcmp.eq.f32.partialorder %v435_v7, 8.507059e+37  ;;  %v438_v62 = vor.u32 1.1754944e-38, %v437_v3  ;;  %v460_v1 = vadd.f32 %v1174_v63, %v459_v43  ;;  %526 = vst [vmem:[#allocation1 + $0x3] ss:$9 sm:$0xff] %v513_v40  ;;  %vm1294_vm13 = vmor %vm476_vm14, %vm477_vm5 }
  0x5e   : > { %vm1268_vm9 = vcmp.eq.f32.partialorder %v450_v26, 8.507059e+37  ;;  %v475_v25 = vadd.f32 %v1182_v4, %v474_v46  ;;  %v480_v5 = vand.u32 2147483647, %v1107_v32  ;;  %528 = vst [vmem:[#allocation1 + $0x4] ss:$9 sm:$0xff] %v514_v47  ;;  %v541_v6 = vsel %vm493_vm8, %v537_v48, %v539_v61 }
  0x5f   : > { %v434_v7 = vsel %vm1244_vm2, %v1156_v53, %v430_v51  ;;  %v453_v8 = vor.u32 1.1754944e-38, %v452_v33  ;;  %vm1286_vm10 = vcmp.eq.f32.partialorder %v465_v52, 8.507059e+37  ;;  %v543_v10 = vsel %vm496_vm12, %v537_v48, %v539_v61  ;;  %v795_v14 = vld [vmem:[%s1012_s15 + $0x2] ss:$8 sm:$0x3] }
  0x60   : > { %v449_v53 = vsel %vm1263_vm7, %v1162_v60, %v445_v56  ;;  %v468_v11 = vor.u32 1.1754944e-38, %v467_v55  ;;  %v483_v12 = vor.u32 1.1754944e-38, %v482_v57  ;;  %v545_v13 = vsel %vm499_vm15, %v537_v48, %v539_v61  ;;  %v798_v22 = vld [vmem:[%s1012_s15 + $0x32] ss:$8 sm:$0x3] }
  0x61   : > { %v464_v32 = vsel %vm1276_vm1, %v1174_v63, %v460_v1  ;;  %v540_v3 = vsel %vm491_vm11, %v537_v48, %v539_v61  ;;  %v542_v16 = vrot.slane %v541_v6, 1  ;;  %v547_v17 = vsel %vm502_vm0, %v537_v48, %v539_v61  ;;  %v800_v43 = vld [vmem:[%s1012_s15 + $0x3] ss:$8 sm:$0x3] }
  0x62   : > { %v439_v60 = vsel %vm1255_vm6, %v438_v62, %v434_v7  ;;  %v479_v18 = vsel %vm1294_vm13, %v1182_v4, %v475_v25  ;;  %vm481_vm8 = vcmp.eq.f32.partialorder %v480_v5, 8.507059e+37  ;;  %v544_v19 = vrot.slane %v543_v10, 2  ;;  %v801_v40 = vld [vmem:[%s1012_s15 + $0x13] ss:$8 sm:$0x3] }
  0x63   : > { %v454_v63 = vsel %vm1268_vm9, %v453_v8, %v449_v53  ;;  %v546_v21 = vrot.slane %v545_v13, 3  ;;  %v469_v23 = vsel %vm1286_vm10, %v468_v11, %v464_v32  ;;  %v548_v26 = vrot.slane %v547_v17, 4  ;;  %v802_v48 = vld [vmem:[%s1012_s15 + $0x23] ss:$8 sm:$0x3] }
  0x64   : > { %v554_v27 = vadd.f32 %v540_v3, %v424_v59  ;;  %v484_v28 = vsel %vm481_vm8, %v483_v12, %v479_v18  ;;  %v555_v33 = vadd.f32 %v542_v16, %v439_v60  ;;  %v580_v34 = vmul.f32 1.442695, %v795_v14  ;;  %v803_v52 = vld [vmem:[%s1012_s15 + $0x33] ss:$8 sm:$0x3] }
  0x65   : > { %v529_v30 = vld [vmem:[#allocation1] sm:$0xff]  ;;  %v530_v31 = vld [vmem:[#allocation1 + $0x9] sm:$0xff]  ;;  %v556_v4 = vadd.f32 %v544_v19, %v454_v63  ;;  %v582_v36 = vmul.f32 1.442695, %v796_v58  ;;  %v557_v15 = vadd.f32 %v546_v21, %v469_v23  ;;  %v584_v38 = vmul.f32 1.442695, %v797_v20 }
  0x66   : > { %533 = vst [vmem:[%s1324_s18] sm:$0x1f] %v529_v30  ;;  %v558_v39 = vadd.f32 %v548_v26, %v484_v28  ;;  %v586_v41 = vmul.f32 1.442695, %v798_v22  ;;  %886 = vpow2.f32 %v580_v34  ;;  %v588_v37 = vmul.f32 1.442695, %v799_v35 }
  0x67   : > { %534 = vst [vmem:[%s1324_s18 + $0x8] sm:$0x1f] %v530_v31  ;;  %888 = vpow2.f32 %v582_v36  ;;  %v804_v56 = vld [vmem:[%s1012_s15 + $0x43] ss:$8 sm:$0x3] }
  0x68   : > { %564 = vst [vmem:[#allocation1] ss:$9 sm:$0xff] %v554_v27  ;;  %890 = vpow2.f32 %v584_v38  ;;  %v631_v1 = vmul.f32 1.442695, %v800_v43  ;;  %v633_v24 = vmul.f32 1.442695, %v801_v40 }
  0x69   : > { %566 = vst [vmem:[#allocation1 + $0x1] ss:$9 sm:$0xff] %v555_v33  ;;  %892 = vpow2.f32 %v586_v41  ;;  %v635_v5 = vmul.f32 1.442695, %v802_v48  ;;  %v637_v7 = vmul.f32 1.442695, %v803_v52 }
  0x6a   : > { %568 = vst [vmem:[#allocation1 + $0x2] ss:$9 sm:$0xff] %v556_v4  ;;  %894 = vpow2.f32 %v588_v37  ;;  %v639_v8 = vmul.f32 1.442695, %v804_v56 }
  0x6b   : > { %570 = vst [vmem:[#allocation1 + $0x3] ss:$9 sm:$0xff] %v557_v15  ;;  %896 = vpow2.f32 %v631_v1 }
  0x6c   : > { %572 = vst [vmem:[#allocation1 + $0x4] ss:$9 sm:$0xff] %v558_v39  ;;  %v887_v45 = vpop.eup %886  ;;  %898 = vpow2.f32 %v633_v24 }
  0x6d   : > { %v889_v47 = vpop.eup %888  ;;  %900 = vpow2.f32 %v635_v5  ;;  %v704_v23 = vld [vmem:[%s1324_s18] sm:$0xff] (%p991_p5) }
  0x6e   : > { %v891_v51 = vpop.eup %890  ;;  %902 = vpow2.f32 %v637_v7  ;;  %v706_v26 = vld [vmem:[%s1324_s18 + $0x8] sm:$0xff] (%p991_p5)  ;;  %705 = vst [vmem:[%s691_s6] sm:$0xff] (%p991_p5), %v704_v23 }
  0x6f   : > { %v893_v54 = vpop.eup %892  ;;  %904 = vpow2.f32 %v639_v8  ;;  %707 = vst [vmem:[%s691_s6 + $0x8] sm:$0xff] (%p991_p5), %v706_v26 }
  0x70   : > { %v895_v59 = vpop.eup %894 }
  0x71   : > { %v897_v10 = vpop.eup %896 }
  0x72   : > { %v899_v11 = vpop.eup %898 }
  0x73   : > { %v573_v49 = vld [vmem:[#allocation1] sm:$0xff]  ;;  %v574_v62 = vld [vmem:[#allocation1 + $0x9] sm:$0xff]  ;;  %v901_v13 = vpop.eup %900 }
  0x74   : > { %805 = vst [vmem:[%s1324_s18 + $0x10] sm:$0x1f] %v573_v49  ;;  %v903_v32 = vpop.eup %902 }
  0x75   : > { %806 = vst [vmem:[%s1324_s18 + $0x18] sm:$0x1f] %v574_v62  ;;  %v905_v17 = vpop.eup %904 }
  0x7b   : > { %v708_v27 = vld [vmem:[%s1324_s18 + $0x10] sm:$0xff] (%p991_p5) }
  0x7c   : > { %v710_v28 = vld [vmem:[%s1324_s18 + $0x18] sm:$0xff] (%p991_p5)  ;;  %709 = vst [vmem:[%s691_s6 + $0x20] sm:$0xff] (%p991_p5), %v708_v27 }
  0x7d   : > { %711 = vst [vmem:[%s691_s6 + $0x28] sm:$0xff] (%p991_p5), %v710_v28 }
  0x9b   : > { %v594_v42 = vpop.permute.xlu0 %593 }
  0x9c   : > { %v595_v44 = vperm.slane %v594_v42, 0  ;;  %v596_v46 = vperm.slane %v594_v42, 1  ;;  %v597_v50 = vperm.slane %v594_v42, 2  ;;  %v598_v55 = vperm.slane %v594_v42, 3 }
  0x9d   : > { %v599_v57 = vperm.slane %v594_v42, 4 }
  0x9e   : > { %v605_v61 = vmul.f32 %v887_v45, %v595_v44  ;;  %v606_v0 = vmul.f32 %v889_v47, %v596_v46  ;;  %v607_v2 = vmul.f32 %v891_v51, %v597_v50  ;;  %v608_v25 = vmul.f32 %v893_v54, %v598_v55 }
  0x9f   : > { %v609_v6 = vmul.f32 %v895_v59, %v599_v57 }
  0xa0   : > { %615 = vst [vmem:[#allocation1] ss:$9 sm:$0xff] %v605_v61 }
  0xa1   : > { %617 = vst [vmem:[#allocation1 + $0x1] ss:$9 sm:$0xff] %v606_v0 }
  0xa2   : > { %619 = vst [vmem:[#allocation1 + $0x2] ss:$9 sm:$0xff] %v607_v2 }
  0xa3   : > { %v645_v29 = vpop.permute.xlu0 %644  ;;  %621 = vst [vmem:[#allocation1 + $0x3] ss:$9 sm:$0xff] %v608_v25 }
  0xa4   : > { %623 = vst [vmem:[#allocation1 + $0x4] ss:$9 sm:$0xff] %v609_v6  ;;  %v646_v9 = vperm.slane %v645_v29, 0  ;;  %v647_v53 = vperm.slane %v645_v29, 1  ;;  %v648_v12 = vperm.slane %v645_v29, 2  ;;  %v649_v14 = vperm.slane %v645_v29, 3 }
  0xa5   : > { %v650_v3 = vperm.slane %v645_v29, 4 }
  0xa6   : > { %v656_v16 = vmul.f32 %v897_v10, %v646_v9  ;;  %v657_v18 = vmul.f32 %v899_v11, %v647_v53  ;;  %v658_v19 = vmul.f32 %v901_v13, %v648_v12  ;;  %v659_v20 = vmul.f32 %v903_v32, %v649_v14 }
  0xa7   : > { %v660_v63 = vmul.f32 %v905_v17, %v650_v3 }
  0xab   : > { %v624_v58 = vld [vmem:[#allocation1] sm:$0xff]  ;;  %v625_v60 = vld [vmem:[#allocation1 + $0x9] sm:$0xff] }
  0xac   : > { %807 = vst [vmem:[%s1324_s18 + $0x20] sm:$0x1f] %v624_v58 }
  0xad   : > { %808 = vst [vmem:[%s1324_s18 + $0x28] sm:$0x1f] %v625_v60 }
  0xae   : > { %666 = vst [vmem:[#allocation1] ss:$9 sm:$0xff] %v656_v16 }
  0xaf   : > { %668 = vst [vmem:[#allocation1 + $0x1] ss:$9 sm:$0xff] %v657_v18 }
  0xb0   : > { %670 = vst [vmem:[#allocation1 + $0x2] ss:$9 sm:$0xff] %v658_v19 }
  0xb1   : > { %672 = vst [vmem:[#allocation1 + $0x3] ss:$9 sm:$0xff] %v659_v20 }
  0xb2   : > { %674 = vst [vmem:[#allocation1 + $0x4] ss:$9 sm:$0xff] %v660_v63 }
  0xb3   : > { %v712_v30 = vld [vmem:[%s1324_s18 + $0x20] sm:$0xff] (%p991_p5) }
  0xb4   : > { %v714_v31 = vld [vmem:[%s1324_s18 + $0x28] sm:$0xff] (%p991_p5)  ;;  %713 = vst [vmem:[%s691_s6 + $0x40] sm:$0xff] (%p991_p5), %v712_v30 }
  0xb5   : > { %715 = vst [vmem:[%s691_s6 + $0x48] sm:$0xff] (%p991_p5), %v714_v31 }
  0xb7   : > { %688 = sbr.rel (!%p991_p5) target bundleno = 196 (0xc4), region = 67 }
  0xb9   : > { %v675_v21 = vld [vmem:[#allocation1] sm:$0xff]  ;;  %v676_v22 = vld [vmem:[#allocation1 + $0x9] sm:$0xff] }
  0xba   : > { %809 = vst [vmem:[%s1324_s18 + $0x30] sm:$0x1f] %v675_v21 }
  0xbb   : > { %810 = vst [vmem:[%s1324_s18 + $0x38] sm:$0x1f] %v676_v22 }
  0xc1   : > { %v716_v33 = vld [vmem:[%s1324_s18 + $0x30] sm:$0xff] }
  0xc2   : > { %v718_v34 = vld [vmem:[%s1324_s18 + $0x38] sm:$0xff]  ;;  %717 = vst [vmem:[%s691_s6 + $0x60] sm:$0xff] %v716_v33 }
  0xc3   : > { %719 = vst [vmem:[%s691_s6 + $0x68] sm:$0xff] %v718_v34 }
  0xc4 PF: > { %p12_p10 = scmp.ge.s32.totalorder %s978_s22, 4   ;;  %s1407_s18 = smov %s924_s19 }
  0xc5   : > { %s1408_s19 = smov %s989_s25  ;;  %s1409_s20 = smov %s978_s22 }
  0xc6   :  { %14 = sbr.rel (!%p12_p10) target bundleno = 2 (0x2), region = 159 }

</bundles_post_ra>
